<compile_context>
chip_gen: v7x
topology: tpu7x:2x2x1
jax: 0.10.0
libtpu: 0.0.40
codegen_flags: <defaults>
</compile_context>

<pallas_src>
import functools

import jax
import jax.numpy as jnp
from jax import lax
from jax.experimental import pallas as pl
from jax.experimental.pallas import tpu as pltpu

_LANE = 128
# 4096 rows x 128 lanes x 4 B = 2 MiB per operand per pipeline buffer.
_MAX_TILE_ROWS = 4096
_SUBLANE_ALIGN = 32  # covers f32 (8,128), bf16 (16,128), int8/fp8 (32,128)


def _round_up(x, m):
    return (x + m - 1) // m * m


def _elementwise_bce(y, x, from_logits):
    """Per-element BCE loss, f32 in / f32 out."""
    if from_logits:
        # numerically stable binary_cross_entropy_with_logits
        return jnp.maximum(x, 0.0) - x * y + jnp.log1p(jnp.exp(-jnp.abs(x)))
    # binary_cross_entropy: PyTorch clamps the log terms at -100.
    log_p = jnp.maximum(jnp.log(x), -100.0)
    log_1mp = jnp.maximum(jnp.log(1.0 - x), -100.0)
    return -(y * log_p + (1.0 - y) * log_1mp)


def _bce_tile_kernel(y_ref, x_ref, out_ref, *, rows, tile_rows, from_logits,
                     balanced, needs_mask):
    """Per-tile per-lane partial sums for BCE.

    out_ref block is (1, R, 128):
      balanced:   row 0 = sum(loss), row 1 = sum(loss | y != 0),
                  row 2 = count(y != 0)
      unbalanced: row 0 = sum(loss)
    """
    i = pl.program_id(0)

    y = y_ref[...].astype(jnp.float32)
    x = x_ref[...].astype(jnp.float32)

    def emit(masked):
        if masked:
            r, c = y.shape
            # Row-level bound: the kernel only sees the 128-aligned prefix, so
            # every lane of a valid row is valid.  Row counts stay far below
            # int32 range for any practical n.
            valid_rows = rows - i * tile_rows
            row_i = lax.broadcasted_iota(jnp.int32, (r, c), 0)
            valid = row_i < valid_rows
            maskf = valid.astype(jnp.float32)
            # Sanitize over-read rows so garbage never reaches log/exp
            # (0 * inf / NaN would poison the partial sums).
            yv = jnp.where(valid, y, 0.0)
            xv = jnp.where(valid, x, 0.0 if from_logits else 0.5)
        else:
            maskf = None
            yv, xv = y, x

        loss = _elementwise_bce(yv, xv, from_logits)
        if masked:
            loss = loss * maskf

        if balanced:
            is1 = jnp.where(yv == 0.0, 0.0, 1.0)        # 0 on masked rows too
            total = jnp.sum(loss, axis=0, keepdims=True)                # (1,128)
            s1 = jnp.sum(jnp.where(yv == 0.0, 0.0, loss), axis=0,
                         keepdims=True)                                 # (1,128)
            c1 = jnp.sum(is1, axis=0, keepdims=True)                    # (1,128)
            out_ref[0, 0:1, :] = total
            out_ref[0, 1:2, :] = s1
            out_ref[0, 2:3, :] = c1
        else:
            out_ref[0, 0:1, :] = jnp.sum(loss, axis=0, keepdims=True)   # (1,128)

    if not needs_mask:
        emit(False)
    else:
        ragged = i == pl.num_programs(0) - 1

        @pl.when(ragged)
        def _():
            emit(True)

        @pl.when(jnp.logical_not(ragged))
        def _():
            emit(False)


def bce_loss(y_true, y_pred, *, from_logits, reduction="mean", balanced=None):
    """Pallas implementation of BCELoss.forward (flatten -> weight -> BCE -> reduce)."""
    if reduction == "none":
        # TODO(synk): reduction='none' needs an elementwise output buffer (and
        # a second pass / resident weights for balanced=True); not implemented.
        raise NotImplementedError("reduction='none' is not supported")

    balanced = bool(balanced)
    from_logits = bool(from_logits)

    y_flat = jnp.reshape(y_true, (-1,))
    x_flat = jnp.reshape(y_pred, (-1,))
    n = y_flat.shape[0]
    n_f = jnp.float32(n)

    # Stream the 128-lane-aligned prefix through the kernel; the remainder
    # (< 128 elements) is handled by a tiny plain-JAX epilogue below.
    n_aligned = (n // _LANE) * _LANE
    rows = n_aligned // _LANE

    total_sum = jnp.float32(0.0)
    s1_sum = jnp.float32(0.0)
    c1_sum = jnp.float32(0.0)

    if rows > 0:
        y2 = y_flat[:n_aligned].reshape(rows, _LANE)
        x2 = x_flat[:n_aligned].reshape(rows, _LANE)

        tile_rows = min(_MAX_TILE_ROWS, _round_up(rows, _SUBLANE_ALIGN))
        num_tiles = pl.cdiv(rows, tile_rows)
        needs_mask = (num_tiles * tile_rows) != rows
        out_rows = 3 if balanced else 1

        kernel = functools.partial(
            _bce_tile_kernel,
            rows=rows,
            tile_rows=tile_rows,
            from_logits=from_logits,
            balanced=balanced,
            needs_mask=needs_mask,
        )

        partials = pl.pallas_call(
            kernel,
            out_shape=jax.ShapeDtypeStruct((num_tiles, out_rows, _LANE),
                                           jnp.float32),
            grid=(num_tiles,),
            in_specs=[
                pl.BlockSpec((tile_rows, _LANE), lambda i: (i, 0)),
                pl.BlockSpec((tile_rows, _LANE), lambda i: (i, 0)),
            ],
            out_specs=pl.BlockSpec((1, out_rows, _LANE), lambda i: (i, 0, 0)),
            compiler_params=pltpu.CompilerParams(
                dimension_semantics=("parallel",),
                vmem_limit_bytes=32 * 1024 * 1024),
        )(y2, x2)

        sums = jnp.sum(partials, axis=(0, 2))  # (out_rows,)
        total_sum = sums[0]
        if balanced:
            s1_sum = sums[1]
            c1_sum = sums[2]

    # <=127-element tail (no jnp.pad: padding would materialize a full HBM
    # copy of both operands and double the streaming traffic).
    if n_aligned != n:
        y_t = y_flat[n_aligned:].astype(jnp.float32)
        x_t = x_flat[n_aligned:].astype(jnp.float32)
        loss_t = _elementwise_bce(y_t, x_t, from_logits)
        total_sum = total_sum + jnp.sum(loss_t)
        if balanced:
            is1_t = jnp.where(y_t == 0.0, 0.0, 1.0)
            s1_sum = s1_sum + jnp.sum(loss_t * is1_t)
            c1_sum = c1_sum + jnp.sum(is1_t)

    if balanced:
        s0 = total_sum - s1_sum
        c1 = c1_sum
        c0 = n_f - c1
        w0 = n_f / (2.0 * c0)
        w1 = n_f / (2.0 * c1)
        weighted = (jnp.where(c0 > 0, w0 * s0, 0.0)
                    + jnp.where(c1 > 0, w1 * s1_sum, 0.0))
        # PyTorch: single-class (all-zero) labels -> bincount of length 1 ->
        # weights not applied at all.
        total = jnp.where(c1 == 0, total_sum, weighted)
    else:
        total = total_sum

    if reduction == "sum":
        return total
    return total / n_f  # 'mean'


def _reference(y_true, y_pred, *, from_logits, reduction="mean", balanced=None):
    y = jnp.reshape(y_true, (-1,)).astype(jnp.float32)
    x = jnp.reshape(y_pred, (-1,)).astype(jnp.float32)
    n = y.shape[0]
    if balanced:
        c1 = jnp.sum(jnp.where(y == 0.0, 0.0, 1.0))
        c0 = n - c1
        w = jnp.where(y == 0.0, n / (2.0 * c0), n / (2.0 * c1))
    else:
        w = jnp.ones_like(y)
    if from_logits:
        l = jnp.maximum(x, 0.0) - x * y + jnp.log1p(jnp.exp(-jnp.abs(x)))
    else:
        l = -(y * jnp.maximum(jnp.log(x), -100.0)
              + (1.0 - y) * jnp.maximum(jnp.log(1.0 - x), -100.0))
    l = l * w
    return jnp.mean(l) if reduction == "mean" else jnp.sum(l)


if __name__ == "__main__":
    key = jax.random.PRNGKey(0)
    k1, k2, k3, k4, k5, k6 = jax.random.split(key, 6)

    # Dense-prediction-style BCE use case (NCHW-like), lane-aligned size.
    shape = (2, 4, 16, 16)
    y_true = (jax.random.uniform(k1, shape) > 0.5).astype(jnp.float32)
    logits = jax.random.normal(k2, shape, dtype=jnp.float32)
    probs = jax.nn.sigmoid(logits)

    # from_logits=True, balanced, mean reduction (masked-tile path).
    out1 = bce_loss(y_true, logits, from_logits=True, reduction="mean",
                    balanced=True)
    jax.block_until_ready(out1)
    ref1 = _reference(y_true, logits, from_logits=True, reduction="mean",
                      balanced=True)
    assert jnp.allclose(out1, ref1, rtol=1e-5, atol=1e-5)

    # from_logits=False (probabilities), unbalanced, mean reduction.
    out2 = bce_loss(y_true, probs, from_logits=False, reduction="mean",
                    balanced=None)
    jax.block_until_ready(out2)
    ref2 = _reference(y_true, probs, from_logits=False, reduction="mean",
                      balanced=None)
    assert jnp.allclose(out2, ref2, rtol=1e-5, atol=1e-5)

    # Ragged size (not a multiple of 128) -> exercises the plain-JAX tail;
    # from_logits=True, balanced, sum reduction.
    rshape = (3, 5, 7, 2)
    y_true_r = (jax.random.uniform(k3, rshape) > 0.5).astype(jnp.float32)
    logits_r = jax.random.normal(k4, rshape, dtype=jnp.float32)
    out3 = bce_loss(y_true_r, logits_r, from_logits=True, reduction="sum",
                    balanced=True)
    jax.block_until_ready(out3)
    ref3 = _reference(y_true_r, logits_r, from_logits=True, reduction="sum",
                      balanced=True)
    assert jnp.allclose(out3, ref3, rtol=1e-5, atol=1e-4)

    # Exactly 32 rows -> exercises the unmasked (full-tile) path;
    # from_logits=False, balanced, mean reduction.
    fshape = (2, 4, 32, 16)
    y_true_f = (jax.random.uniform(k5, fshape) > 0.5).astype(jnp.float32)
    probs_f = jax.nn.sigmoid(jax.random.normal(k6, fshape, dtype=jnp.float32))
    out4 = bce_loss(y_true_f, probs_f, from_logits=False, reduction="mean",
                    balanced=True)
    jax.block_until_ready(out4)
    ref4 = _reference(y_true_f, probs_f, from_logits=False, reduction="mean",
                      balanced=True)
    assert jnp.allclose(out4, ref4, rtol=1e-5, atol=1e-5)

    print("KERNEL_OK")
</pallas_src>

<mosaic_0001>
module attributes {stable_mosaic.version = 11 : i64} {
  func.func @_bce_tile_kernel(%arg0: i32, %arg1: memref<32x128xf32, #tpu.memory_space<vmem>>, %arg2: memref<32x128xf32, #tpu.memory_space<vmem>>, %arg3: memref<1x3x128xf32, #tpu.memory_space<vmem>>) attributes {dimension_semantics = [#tpu.dimension_semantics<parallel>], iteration_bounds = array<i64: 1>, scalar_prefetch = 0 : i64, scratch_operands = 0 : i64, tpu.core_type = #tpu.core_type<tc>, window_params = [{transform_indices = @transform_0, window_bounds = array<i64: 32, 128>}, {transform_indices = @transform_1, window_bounds = array<i64: 32, 128>}, {transform_indices = @transform_2, window_bounds = array<i64: 1, 3, 128>}]} {
    %c0 = arith.constant 0 : index
    %c0_0 = arith.constant 0 : index
    %0 = vector.load %arg1[%c0, %c0_0] : memref<32x128xf32, #tpu.memory_space<vmem>>, vector<32x128xf32>
    %c0_1 = arith.constant 0 : index
    %c0_2 = arith.constant 0 : index
    %1 = vector.load %arg2[%c0_1, %c0_2] : memref<32x128xf32, #tpu.memory_space<vmem>>, vector<32x128xf32>
    %c0_i32 = arith.constant 0 : i32
    %2 = arith.cmpi eq, %arg0, %c0_i32 : i32
    %3 = arith.extui %2 : i1 to i32
    %c0_i32_3 = arith.constant 0 : i32
    %4 = arith.cmpi ne, %3, %c0_i32_3 : i32
    scf.if %4 {
      %c32_i32 = arith.constant 32 : i32
      %8 = arith.muli %arg0, %c32_i32 : i32
      %c16_i32 = arith.constant 16 : i32
      %9 = arith.subi %c16_i32, %8 : i32
      %10 = tpu.iota {dimensions = array<i32: 0>} : vector<32x128xi32>
      %11 = vector.broadcast %9 : i32 to vector<32x128xi32>
      %12 = arith.cmpi slt, %10, %11 : vector<32x128xi32>
      %13 = arith.extui %12 : vector<32x128xi1> to vector<32x128xi32>
      %14 = arith.sitofp %13 : vector<32x128xi32> to vector<32x128xf32>
      %cst = arith.constant 0.000000e+00 : f32
      %15 = vector.broadcast %cst : f32 to vector<32x128xf32>
      %16 = arith.select %12, %0, %15 : vector<32x128xi1>, vector<32x128xf32>
      %cst_5 = arith.constant 0.000000e+00 : f32
      %17 = vector.broadcast %cst_5 : f32 to vector<32x128xf32>
      %18 = arith.select %12, %1, %17 : vector<32x128xi1>, vector<32x128xf32>
      %cst_6 = arith.constant 0.000000e+00 : f32
      %19 = vector.broadcast %cst_6 : f32 to vector<32x128xf32>
      %20 = arith.maximumf %18, %19 : vector<32x128xf32>
      %21 = arith.mulf %18, %16 : vector<32x128xf32>
      %22 = arith.subf %20, %21 : vector<32x128xf32>
      %23 = math.absf %18 : vector<32x128xf32>
      %cst_7 = arith.constant 0.000000e+00 : f32
      %24 = vector.broadcast %cst_7 : f32 to vector<32x128xf32>
      %25 = arith.subf %24, %23 : vector<32x128xf32>
      %26 = math.exp %25 : vector<32x128xf32>
      %27 = math.log1p %26 : vector<32x128xf32>
      %28 = arith.addf %22, %27 : vector<32x128xf32>
      %29 = arith.mulf %28, %14 : vector<32x128xf32>
      %cst_8 = arith.constant 0.000000e+00 : f32
      %30 = vector.broadcast %cst_8 : f32 to vector<32x128xf32>
      %31 = arith.cmpf oeq, %16, %30 : vector<32x128xf32>
      %cst_9 = arith.constant 0.000000e+00 : f32
      %cst_10 = arith.constant 1.000000e+00 : f32
      %32 = vector.broadcast %cst_9 : f32 to vector<32x128xf32>
      %33 = vector.broadcast %cst_10 : f32 to vector<32x128xf32>
      %34 = arith.select %31, %32, %33 : vector<32x128xi1>, vector<32x128xf32>
      %cst_11 = arith.constant dense<0.000000e+00> : vector<128xf32>
      %35 = vector.multi_reduction <add>, %29, %cst_11 [0] : vector<32x128xf32> to vector<128xf32>
      %36 = vector.shape_cast %35 : vector<128xf32> to vector<1x128xf32>
      %cst_12 = arith.constant 0.000000e+00 : f32
      %37 = vector.broadcast %cst_12 : f32 to vector<32x128xf32>
      %38 = arith.cmpf oeq, %16, %37 : vector<32x128xf32>
      %cst_13 = arith.constant 0.000000e+00 : f32
      %39 = vector.broadcast %cst_13 : f32 to vector<32x128xf32>
      %40 = arith.select %38, %39, %29 : vector<32x128xi1>, vector<32x128xf32>
      %cst_14 = arith.constant dense<0.000000e+00> : vector<128xf32>
      %41 = vector.multi_reduction <add>, %40, %cst_14 [0] : vector<32x128xf32> to vector<128xf32>
      %42 = vector.shape_cast %41 : vector<128xf32> to vector<1x128xf32>
      %cst_15 = arith.constant dense<0.000000e+00> : vector<128xf32>
      %43 = vector.multi_reduction <add>, %34, %cst_15 [0] : vector<32x128xf32> to vector<128xf32>
      %44 = vector.shape_cast %43 : vector<128xf32> to vector<1x128xf32>
      %c0_16 = arith.constant 0 : index
      %c0_17 = arith.constant 0 : index
      %c0_18 = arith.constant 0 : index
      %45 = vector.load %arg3[%c0_16, %c0_17, %c0_18] : memref<1x3x128xf32, #tpu.memory_space<vmem>>, vector<1x1x128xf32>
      %46 = vector.shape_cast %45 : vector<1x1x128xf32> to vector<1x128xf32>
      %47 = vector.shape_cast %36 : vector<1x128xf32> to vector<1x1x128xf32>
      tpu.vector_store %arg3[%c0_16, %c0_17, %c0_18], %47 {strides = array<i32>} : memref<1x3x128xf32, #tpu.memory_space<vmem>>, vector<1x1x128xf32>,
      %c0_19 = arith.constant 0 : index
      %c1 = arith.constant 1 : index
      %c0_20 = arith.constant 0 : index
      %48 = vector.load %arg3[%c0_19, %c1, %c0_20] : memref<1x3x128xf32, #tpu.memory_space<vmem>>, vector<1x1x128xf32>
      %49 = vector.shape_cast %48 : vector<1x1x128xf32> to vector<1x128xf32>
      %50 = vector.shape_cast %42 : vector<1x128xf32> to vector<1x1x128xf32>
      tpu.vector_store %arg3[%c0_19, %c1, %c0_20], %50 {strides = array<i32>} : memref<1x3x128xf32, #tpu.memory_space<vmem>>, vector<1x1x128xf32>,
      %c0_21 = arith.constant 0 : index
      %c2 = arith.constant 2 : index
      %c0_22 = arith.constant 0 : index
      %51 = vector.load %arg3[%c0_21, %c2, %c0_22] : memref<1x3x128xf32, #tpu.memory_space<vmem>>, vector<1x1x128xf32>
      %52 = vector.shape_cast %51 : vector<1x1x128xf32> to vector<1x128xf32>
      %53 = vector.shape_cast %44 : vector<1x128xf32> to vector<1x1x128xf32>
      tpu.vector_store %arg3[%c0_21, %c2, %c0_22], %53 {strides = array<i32>} : memref<1x3x128xf32, #tpu.memory_space<vmem>>, vector<1x1x128xf32>,
    } else {
    }
    %true = arith.constant true
    %5 = arith.xori %2, %true : i1
    %6 = arith.extui %5 : i1 to i32
    %c0_i32_4 = arith.constant 0 : i32
    %7 = arith.cmpi ne, %6, %c0_i32_4 : i32
    scf.if %7 {
      %cst = arith.constant 0.000000e+00 : f32
      %8 = vector.broadcast %cst : f32 to vector<32x128xf32>
      %9 = arith.maximumf %1, %8 : vector<32x128xf32>
      %10 = arith.mulf %1, %0 : vector<32x128xf32>
      %11 = arith.subf %9, %10 : vector<32x128xf32>
      %12 = math.absf %1 : vector<32x128xf32>
      %cst_5 = arith.constant 0.000000e+00 : f32
      %13 = vector.broadcast %cst_5 : f32 to vector<32x128xf32>
      %14 = arith.subf %13, %12 : vector<32x128xf32>
      %15 = math.exp %14 : vector<32x128xf32>
      %16 = math.log1p %15 : vector<32x128xf32>
      %17 = arith.addf %11, %16 : vector<32x128xf32>
      %cst_6 = arith.constant 0.000000e+00 : f32
      %18 = vector.broadcast %cst_6 : f32 to vector<32x128xf32>
      %19 = arith.cmpf oeq, %0, %18 : vector<32x128xf32>
      %cst_7 = arith.constant 0.000000e+00 : f32
      %cst_8 = arith.constant 1.000000e+00 : f32
      %20 = vector.broadcast %cst_7 : f32 to vector<32x128xf32>
      %21 = vector.broadcast %cst_8 : f32 to vector<32x128xf32>
      %22 = arith.select %19, %20, %21 : vector<32x128xi1>, vector<32x128xf32>
      %cst_9 = arith.constant dense<0.000000e+00> : vector<128xf32>
      %23 = vector.multi_reduction <add>, %17, %cst_9 [0] : vector<32x128xf32> to vector<128xf32>
      %24 = vector.shape_cast %23 : vector<128xf32> to vector<1x128xf32>
      %cst_10 = arith.constant 0.000000e+00 : f32
      %25 = vector.broadcast %cst_10 : f32 to vector<32x128xf32>
      %26 = arith.cmpf oeq, %0, %25 : vector<32x128xf32>
      %cst_11 = arith.constant 0.000000e+00 : f32
      %27 = vector.broadcast %cst_11 : f32 to vector<32x128xf32>
      %28 = arith.select %26, %27, %17 : vector<32x128xi1>, vector<32x128xf32>
      %cst_12 = arith.constant dense<0.000000e+00> : vector<128xf32>
      %29 = vector.multi_reduction <add>, %28, %cst_12 [0] : vector<32x128xf32> to vector<128xf32>
      %30 = vector.shape_cast %29 : vector<128xf32> to vector<1x128xf32>
      %cst_13 = arith.constant dense<0.000000e+00> : vector<128xf32>
      %31 = vector.multi_reduction <add>, %22, %cst_13 [0] : vector<32x128xf32> to vector<128xf32>
      %32 = vector.shape_cast %31 : vector<128xf32> to vector<1x128xf32>
      %c0_14 = arith.constant 0 : index
      %c0_15 = arith.constant 0 : index
      %c0_16 = arith.constant 0 : index
      %33 = vector.load %arg3[%c0_14, %c0_15, %c0_16] : memref<1x3x128xf32, #tpu.memory_space<vmem>>, vector<1x1x128xf32>
      %34 = vector.shape_cast %33 : vector<1x1x128xf32> to vector<1x128xf32>
      %35 = vector.shape_cast %24 : vector<1x128xf32> to vector<1x1x128xf32>
      tpu.vector_store %arg3[%c0_14, %c0_15, %c0_16], %35 {strides = array<i32>} : memref<1x3x128xf32, #tpu.memory_space<vmem>>, vector<1x1x128xf32>,
      %c0_17 = arith.constant 0 : index
      %c1 = arith.constant 1 : index
      %c0_18 = arith.constant 0 : index
      %36 = vector.load %arg3[%c0_17, %c1, %c0_18] : memref<1x3x128xf32, #tpu.memory_space<vmem>>, vector<1x1x128xf32>
      %37 = vector.shape_cast %36 : vector<1x1x128xf32> to vector<1x128xf32>
      %38 = vector.shape_cast %30 : vector<1x128xf32> to vector<1x1x128xf32>
      tpu.vector_store %arg3[%c0_17, %c1, %c0_18], %38 {strides = array<i32>} : memref<1x3x128xf32, #tpu.memory_space<vmem>>, vector<1x1x128xf32>,
      %c0_19 = arith.constant 0 : index
      %c2 = arith.constant 2 : index
      %c0_20 = arith.constant 0 : index
      %39 = vector.load %arg3[%c0_19, %c2, %c0_20] : memref<1x3x128xf32, #tpu.memory_space<vmem>>, vector<1x1x128xf32>
      %40 = vector.shape_cast %39 : vector<1x1x128xf32> to vector<1x128xf32>
      %41 = vector.shape_cast %32 : vector<1x128xf32> to vector<1x1x128xf32>
      tpu.vector_store %arg3[%c0_19, %c2, %c0_20], %41 {strides = array<i32>} : memref<1x3x128xf32, #tpu.memory_space<vmem>>, vector<1x1x128xf32>,
    } else {
    }
    return
  }
  func.func @transform_0(%arg0: i32) -> (i32, i32) {
    %c0_i32 = arith.constant 0 : i32
    %c0_i32_0 = arith.constant 0 : i32
    return %arg0, %c0_i32 : i32, i32
  }
  func.func @transform_1(%arg0: i32) -> (i32, i32) {
    %c0_i32 = arith.constant 0 : i32
    %c0_i32_0 = arith.constant 0 : i32
    return %arg0, %c0_i32 : i32, i32
  }
  func.func @transform_2(%arg0: i32) -> (i32, i32, i32) {
    %c0_i32 = arith.constant 0 : i32
    %c0_i32_0 = arith.constant 0 : i32
    %c0_i32_1 = arith.constant 0 : i32
    return %arg0, %c0_i32, %c0_i32_0 : i32, i32, i32
  }
}

</mosaic_0001>

<bundles_post_ra>
// kernel: tpu_custom_call.1
= control target key start
LH: loop header
LB: loop body
LE: loop exit
PB: predicated region body
PF: predicated region fallthrough
CT: control target
= control target key end

     0   :  { %7 = vsyncpa [#allocation3], 0  ;;  %s431_s0 = inlined_call_operand.hbm [shape: f32[16,128], index: 0, kind: input, shape index: {}]   ;;  %s432_s1 = inlined_call_operand.hbm [shape: f32[16,128], index: 1, kind: input, shape index: {}]   ;;  %s433_s2 = inlined_call_operand.vmem [shape: f32[1,3,128], index: 2, kind: output, shape index: {}]  }
   0x1   :  { %8 = vsyncpa [#allocation5], 0 }
   0x2   :  { %13 = vsyncadd [#allocation3], 256  ;;  %s374_s9 = smov [#allocation2]   ;;  %s326_s13 = scalar_lea.hbm %s431_s0, 256 }
   0x3   :  { %s14_s10 = sshll.u32 %s374_s9, 4  ;;  %p327_p0 = scmp.ne.s32.totalorder %s431_s0, %s326_s13  ;;  %s15_s10 = int_to_ptr.vmem [resolvable:$true] %s14_s10 }
   0x4   :  { %p330_p1 = scmp.lt.u32.totalorder %s326_s13, %s431_s0 }
   0x6   :  { %p332_p2 = pnand %p330_p1, %p327_p0 }
   0x8   :  { %335 = shalt.err (!%p332_p2)
}
   0x9   :  { %s336_s18 = scalar_lea.vmem %s15_s10, 256  ;;  %s340_s19 = scalar_lea.vmem %s15_s10, 512 }
   0xa   :  { %p337_p3 = scmp.ne.s32.totalorder %s15_s10, %s336_s18  ;;  %p341_p4 = scmp.lt.s32.totalorder %s15_s10, %s15_s10 }
   0xb   :  { %p342_p5 = scmp.lt.s32.totalorder %s340_s19, %s336_s18 }
   0xd   :  { %p343_p6 = por %p342_p5, %p341_p4 }
   0xf   :  { %p344_p7 = pnand %p343_p6, %p337_p3 }
  0x11   :  { %347 = shalt.err (!%p344_p7)
}
  0x12   :  { %s375_s20 = smov 128   ;;  %s376_s21 = smov 8  }
  0x13   :  { %20 = dma.hbm_to_vmem [thread:$0]  %s431_s0, 256, %s15_s10, [#allocation3], %s375_s20, %s375_s20, %s376_s21  }
  0x14   :  { %25 = vsyncadd [#allocation5], 256  ;;  %s377_s24 = smov [#allocation4]   ;;  %s348_s28 = scalar_lea.hbm %s432_s1, 256 }
  0x15   :  { %s26_s25 = sshll.u32 %s377_s24, 4  ;;  %p349_p8 = scmp.ne.s32.totalorder %s432_s1, %s348_s28  ;;  %s27_s25 = int_to_ptr.vmem [resolvable:$true] %s26_s25 }
  0x16   :  { %p352_p9 = scmp.lt.u32.totalorder %s348_s28, %s432_s1 }
  0x18   :  { %p354_p10 = pnand %p352_p9, %p349_p8 }
  0x1a   :  { %357 = shalt.err (!%p354_p10)
}
  0x1b   :  { %s358_s5 = scalar_lea.vmem %s27_s25, 256  ;;  %s362_s0 = scalar_lea.vmem %s27_s25, 512 }
  0x1c   :  { %p359_p11 = scmp.ne.s32.totalorder %s27_s25, %s358_s5  ;;  %p363_p12 = scmp.lt.s32.totalorder %s27_s25, %s27_s25 }
  0x1d   :  { %p364_p13 = scmp.lt.s32.totalorder %s362_s0, %s358_s5 }
  0x1f   :  { %p365_p0 = por %p364_p13, %p363_p12 }
  0x21   :  { %p366_p1 = pnand %p365_p0, %p359_p11 }
  0x23   :  { %369 = shalt.err (!%p366_p1)
}
  0x24   :  { %32 = dma.hbm_to_vmem [thread:$0]  %s432_s1, 256, %s27_s25, [#allocation5], %s375_s20, %s375_s20, %s376_s21  }
  0x25   :  { %370 = dma.done.wait [#allocation3], 512  }
  0x26   :  { %371 = vsyncadd [#allocation3], 4294966784 }
  0x27   :  { %372 = dma.done.wait [#allocation5], 512  }
  0x28   :  { %373 = vsyncadd [#allocation5], 4294966784  ;;  %v39_v0 = vld [vmem:[#allocation2] sm:$0xff]  ;;  %v40_v2 = vld [vmem:[#allocation2 + $0x8] sm:$0xff]  ;;  %v378_v7 = vmov 1.0  }
  0x29   :  { %v43_v1 = vld [vmem:[#allocation4] sm:$0xff]  ;;  %v44_v3 = vld [vmem:[#allocation4 + $0x8] sm:$0xff]  ;;  %vm151_vm0 = vcmp.eq.f32.partialorder %v39_v0, 0.0  ;;  %vm152_vm1 = vcmp.eq.f32.partialorder %v40_v2, 0.0 }
  0x2a   :  { %v91_v4 = vand.u32 2147483647, %v43_v1  ;;  %v92_v5 = vand.u32 2147483647, %v44_v3  ;;  %v155_v8 = vsel %vm151_vm0, 0.0, %v378_v7  ;;  %v156_v9 = vsel %vm152_vm1, 0.0, %v378_v7 }
  0x2b   :  { %v181_v11 = vadd.f32 %v156_v9, %v155_v8  ;;  %v79_v27 = vmax.f32 %v43_v1, 0.0  ;;  %v83_v28 = vmul.f32 %v43_v1, %v39_v0  ;;  %v80_v31 = vmax.f32 %v44_v3, 0.0 }
  0x2c   :  { %v95_v6 = vsub.f32 0.0, %v91_v4  ;;  %v96_v10 = vsub.f32 0.0, %v92_v5  ;;  %v84_v32 = vmul.f32 %v44_v3, %v40_v2 }
  0x2d   :  { %v184_v14 = vrot.slane %v181_v11, 4  ;;  %v87_v36 = vsub.f32 %v79_v27, %v83_v28 }
  0x2e   :  { %v99_v12 = vmul.f32 1.442695, %v95_v6  ;;  %v101_v13 = vmul.f32 1.442695, %v96_v10  ;;  %v88_v39 = vsub.f32 %v80_v31, %v84_v32 }
  0x2f   :  { %v185_v15 = vadd.f32 %v184_v14, %v181_v11 }
  0x30   :  { %318 = vpow2.f32 %v99_v12 }
  0x31   :  { %320 = vpow2.f32 %v101_v13  ;;  %v186_v16 = vrot.slane %v185_v15, 2 }
  0x33   :  { %v187_v17 = vadd.f32 %v186_v16, %v185_v15 }
  0x35   :  { %v188_v18 = vrot.slane %v187_v17, 1 }
  0x37   :  { %v189_v19 = vadd.f32 %v188_v18, %v187_v17 }
  0x39   :  { %192 = vst [vmem:[%s433_s2 + $0x2] sm:$0x1] %v189_v19 }
  0x3a   :  { %v319_v20 = vpop.eup %318 }
  0x3b   :  { %v321_v21 = vpop.eup %320  ;;  %v107_v22 = vadd.f32 1.0, %v319_v20  ;;  %v110_v24 = vmul.f32 -0.5, %v319_v20  ;;  %v113_v29 = vand.u32 2147483647, %v319_v20 }
  0x3c   :  { %v116_v23 = vadd.f32 1.0, %v321_v21  ;;  %v119_v25 = vmul.f32 -0.5, %v321_v21  ;;  %v122_v33 = vand.u32 2147483647, %v321_v21 }
  0x3d   :  { %322 = vlog2.f32 %v107_v22  ;;  %v111_v26 = vadd.f32 1.0, %v110_v24  ;;  %vm114_vm2 = vcmp.lt.f32.partialorder %v113_v29, 0.0004427343 }
  0x3e   :  { %324 = vlog2.f32 %v116_v23  ;;  %v120_v30 = vadd.f32 1.0, %v119_v25  ;;  %vm123_vm3 = vcmp.lt.f32.partialorder %v122_v33, 0.0004427343 }
  0x3f   :  { %v112_v34 = vmul.f32 %v319_v20, %v111_v26 }
  0x40   :  { %v121_v37 = vmul.f32 %v321_v21, %v120_v30 }
  0x47   :  { %v323_v35 = vpop.eup %322 }
  0x48   :  { %v325_v38 = vpop.eup %324  ;;  %v109_v40 = vmul.f32 0.6931472, %v323_v35 }
  0x49   :  { %v118_v41 = vmul.f32 0.6931472, %v325_v38 }
  0x4a   :  { %v115_v42 = vsel %vm114_vm2, %v112_v34, %v109_v40 }
  0x4b   :  { %v124_v43 = vsel %vm123_vm3, %v121_v37, %v118_v41  ;;  %v143_v44 = vadd.f32 %v115_v42, %v87_v36 }
  0x4c   :  { %v144_v45 = vadd.f32 %v124_v43, %v88_v39 }
  0x4d   :  { %v168_v46 = vsel %vm151_vm0, 0.0, %v143_v44 }
  0x4e   :  { %v159_v47 = vadd.f32 %v144_v45, %v143_v44  ;;  %v169_v48 = vsel %vm152_vm1, 0.0, %v144_v45 }
  0x4f   :  { %v172_v49 = vadd.f32 %v169_v48, %v168_v46 }
  0x50   :  { %v162_v50 = vrot.slane %v159_v47, 4 }
  0x51   :  { %v175_v51 = vrot.slane %v172_v49, 4 }
  0x52   :  { %v163_v52 = vadd.f32 %v162_v50, %v159_v47 }
  0x53   :  { %v176_v53 = vadd.f32 %v175_v51, %v172_v49 }
  0x54   :  { %v164_v54 = vrot.slane %v163_v52, 2 }
  0x55   :  { %v177_v55 = vrot.slane %v176_v53, 2 }
  0x56   :  { %v165_v56 = vadd.f32 %v164_v54, %v163_v52 }
  0x57   :  { %v178_v57 = vadd.f32 %v177_v55, %v176_v53 }
  0x58   :  { %v166_v58 = vrot.slane %v165_v56, 1 }
  0x59   :  { %v179_v59 = vrot.slane %v178_v57, 1 }
  0x5a   :  { %v167_v60 = vadd.f32 %v166_v58, %v165_v56 }
  0x5b   :  { %v180_v61 = vadd.f32 %v179_v59, %v178_v57 }
  0x5c   :  { %190 = vst [vmem:[%s433_s2] sm:$0x1] %v167_v60 }
  0x5d   :  { %191 = vst [vmem:[%s433_s2 + $0x1] sm:$0x1] %v180_v61 }
  0x5e   :  { %311 = vsyncpa [#allocation3], 1 }
  0x5f   :  { %312 = vsyncpa [#allocation5], 1 }

</bundles_post_ra>
